<compile_context>
chip_gen: v7x
topology: tpu7x:2x2x1
jax: 0.10.0
libtpu: 0.0.40
codegen_flags: <defaults>
</compile_context>

<pallas_src>
import functools

import jax
import jax.numpy as jnp
from jax.experimental import pallas as pl
from jax.experimental.pallas import tpu as pltpu


# ----------------------------------------------------------------------------
# helpers
# ----------------------------------------------------------------------------
def _round_up(x, m):
    return ((x + m - 1) // m) * m


def _pick_tm(M, K, N, Nout, a_itemsize, b_itemsize, out_itemsize,
             budget_bytes=24 * 1024 * 1024):
    """Largest row-tile that (a) divides M, (b) keeps the parallel grid axis
    non-degenerate (v7x has 2 TensorCores), (c) fits the VMEM budget."""
    for t in (512, 256, 128):
        if t > M or M % t != 0:
            continue
        if M >= 256 and M // t < 2:
            continue                      # keep >=2 grid steps for megacore
        vmem = (2 * t * K * a_itemsize            # double-buffered A tiles
                + K * N * b_itemsize              # resident RHS
                + N * 4                           # bias (f32)
                + N * Nout * b_itemsize           # optional fused W2
                + 2 * t * Nout * out_itemsize)    # double-buffered output
        if vmem <= budget_bytes:
            return t
    # TODO(synk): for very large node counts (huge K), fall back to a k-tiled
    # accumulator kernel instead of full-K blocks.
    return 128 if M % 128 == 0 else M


def _pick_edge_tile(Ep):
    for t in (512, 256, 128):
        if t <= Ep and Ep % t == 0:
            return t
    return Ep


# ----------------------------------------------------------------------------
# Kernel 1: full-K matmul with resident RHS, fused bias (+ReLU) (+W2) epilogue.
#   out = maybe(@W2)( maybe_relu( A @ B + bias ) )
#   A:(M,K) streamed per row-tile, B:(K,N)/bias:(1,N)/W2:(N,Nout) VMEM-resident.
# ----------------------------------------------------------------------------
def _gcn_layer_kernel(*refs, relu, fuse_w2):
    if fuse_w2:
        a_ref, b_ref, bias_ref, w2_ref, o_ref = refs
    else:
        a_ref, b_ref, bias_ref, o_ref = refs

    acc = jnp.dot(a_ref[...], b_ref[...], preferred_element_type=jnp.float32)
    out = acc + bias_ref[...]                 # bias/ReLU in f32 (v5e-safe)
    if relu:
        out = jnp.maximum(out, 0.0)
    if fuse_w2:
        # Layer-2 weight multiply fused into the epilogue: h1 never hits HBM.
        out = jnp.dot(out.astype(w2_ref.dtype), w2_ref[...],
                      preferred_element_type=jnp.float32)
    o_ref[...] = out.astype(o_ref.dtype)


def gcn_matmul(a, b, bias=None, relu=False, w2=None, out_dtype=jnp.float32):
    M, K = a.shape
    K2, N = b.shape
    assert K == K2, (a.shape, b.shape)
    Nout = N if w2 is None else w2.shape[1]

    bias_arr = (jnp.zeros((1, N), jnp.float32) if bias is None
                else bias.reshape(1, N).astype(jnp.float32))

    out_itemsize = jnp.dtype(out_dtype).itemsize
    tm = _pick_tm(M, K, N, Nout, a.dtype.itemsize, b.dtype.itemsize,
                  out_itemsize)
    grid = (M // tm,)

    in_specs = [
        pl.BlockSpec((tm, K), lambda i: (i, 0)),   # A: streamed row tiles
        pl.BlockSpec((K, N), lambda i: (0, 0)),    # B: constant -> fetched once
        pl.BlockSpec((1, N), lambda i: (0, 0)),    # bias: resident
    ]
    inputs = [a, b, bias_arr]
    if w2 is not None:
        in_specs.append(pl.BlockSpec((N, Nout), lambda i: (0, 0)))  # W2 resident
        inputs.append(w2)

    flops = 2 * M * N * K + (2 * M * N * Nout if w2 is not None else 0)
    bytes_accessed = (M * K * a.dtype.itemsize            # A read once
                      + K * N * b.dtype.itemsize          # B read once
                      + N * 4                             # bias
                      + (N * Nout * w2.dtype.itemsize if w2 is not None else 0)
                      + M * Nout * out_itemsize)          # output written once

    return pl.pallas_call(
        functools.partial(_gcn_layer_kernel, relu=relu, fuse_w2=w2 is not None),
        out_shape=jax.ShapeDtypeStruct((M, Nout), out_dtype),
        grid=grid,
        in_specs=in_specs,
        out_specs=pl.BlockSpec((tm, Nout), lambda i: (i, 0)),
        compiler_params=pltpu.CompilerParams(
            dimension_semantics=("parallel",),
            vmem_limit_bytes=32 * 1024 * 1024),
        cost_estimate=pl.CostEstimate(flops=flops, transcendentals=0,
                                      bytes_accessed=bytes_accessed),
    )(*inputs)


# ----------------------------------------------------------------------------
# Kernel 2: per-edge dot-product score, edges laid along lanes (lane-dense out).
#   src_t, dst_t : (Hp, E_pad)   ->   scores : (1, E_pad)
# ----------------------------------------------------------------------------
def _edge_score_kernel(src_ref, dst_ref, out_ref):
    prod = src_ref[...].astype(jnp.float32) * dst_ref[...].astype(jnp.float32)
    out_ref[...] = jnp.sum(prod, axis=0, keepdims=True)


def edge_scores(src_t, dst_t):
    Hp, Ep = src_t.shape
    te = _pick_edge_tile(Ep)
    return pl.pallas_call(
        _edge_score_kernel,
        out_shape=jax.ShapeDtypeStruct((1, Ep), jnp.float32),
        grid=(Ep // te,),
        in_specs=[
            pl.BlockSpec((Hp, te), lambda e: (0, e)),
            pl.BlockSpec((Hp, te), lambda e: (0, e)),
        ],
        out_specs=pl.BlockSpec((1, te), lambda e: (0, e)),
        compiler_params=pltpu.CompilerParams(
            dimension_semantics=("parallel",)),
    )(src_t, dst_t)


# ----------------------------------------------------------------------------
# Full forward pass (eval mode) of `Net` with model == 'GCN'.
# ----------------------------------------------------------------------------
def gcn_link_pred(adj_hat, x, w1, b1, w2, b2, edge_label_index,
                  compute_dtype=jnp.bfloat16):
    N, F = x.shape
    H = w1.shape[1]
    E = edge_label_index.shape[1]

    # Pad: nodes to a 256 multiple (bigger tiles + non-degenerate parallel grid
    # for v7x megacore), features/hidden to 128 lanes, edges to 128 lanes.
    Np = _round_up(N, 256)
    Fp = _round_up(F, 128)
    Hp = _round_up(H, 128)
    Ep = _round_up(E, 128)

    cd = compute_dtype
    # TODO(synk): on v7x, Â could be stored fp8 (e4m3) to halve the dominant
    # HBM read stream; needs accuracy validation first, so bf16 here.
    adj_c = jnp.zeros((Np, Np), cd).at[:N, :N].set(adj_hat.astype(cd))
    x_c = jnp.zeros((Np, Fp), cd).at[:N, :F].set(x.astype(cd))
    w1_c = jnp.zeros((Fp, Hp), cd).at[:F, :H].set(w1.astype(cd))
    w2_c = jnp.zeros((Hp, Hp), cd).at[:H, :H].set(w2.astype(cd))
    b1_p = jnp.zeros((Hp,), jnp.float32).at[:H].set(b1)
    b2_p = jnp.zeros((Hp,), jnp.float32).at[:H].set(b2)

    # ---- feature transform: xw1 = X @ W1 (stored bf16, read bf16 next) ------
    xw1 = gcn_matmul(x_c, w1_c, out_dtype=cd)                        # (Np, Hp)

    # ---- GCNConv1 + fused W2: hw2 = relu(Â @ xw1 + b1) @ W2 -----------------
    # (dropout p=0.2 between layers is identity in eval mode)
    hw2 = gcn_matmul(adj_c, xw1, bias=b1_p, relu=True, w2=w2_c,
                     out_dtype=cd)                                   # (Np, Hp)

    # ---- GCNConv2 aggregation: h2 = Â @ hw2 + b2 (f32 for score stage) ------
    h2 = gcn_matmul(adj_c, hw2, bias=b2_p, out_dtype=jnp.float32)    # (Np, Hp)

    # ---- link scores: sum(h2[src] * h2[dst], -1) ----------------------------
    # TODO(synk): for very large E, fuse the row gather into the score kernel
    # via PrefetchScalarGridSpec + pl.Element(1) gather; jnp.take is fine here.
    eli_p = jnp.zeros((2, Ep), jnp.int32).at[:, :E].set(
        edge_label_index.astype(jnp.int32))
    src_t = jnp.take(h2, eli_p[0], axis=0).T      # (Hp, Ep) edges along lanes
    dst_t = jnp.take(h2, eli_p[1], axis=0).T
    scores = edge_scores(src_t, dst_t)            # (1, Ep) lane-dense
    return scores[0, :E]


def build_normalized_adj(edge_index, n_nodes):
    """Â = D^{-1/2}(A + I)D^{-1/2}; symmetric edges; self-loop weight forced to 1.
    NOTE: duplicate edges are deduplicated (.set), whereas PyG gcn_norm would
    sum duplicate edge weights — matches only simple graphs."""
    a = jnp.zeros((n_nodes, n_nodes), dtype=jnp.float32)
    a = a.at[edge_index[0], edge_index[1]].set(1.0)
    a = a.at[edge_index[1], edge_index[0]].set(1.0)
    idx = jnp.arange(n_nodes)
    a = a.at[idx, idx].set(1.0)                   # self-loops, weight exactly 1
    deg = jnp.sum(a, axis=1)
    d_inv_sqrt = jnp.where(deg > 0, 1.0 / jnp.sqrt(deg), 0.0)
    return d_inv_sqrt[:, None] * a * d_inv_sqrt[None, :]


if __name__ == "__main__":
    # Small synthetic "Cora-like" problem.  N pads to 512 -> tm=256, grid=2
    # (both v7x TensorCores get a row-tile), full-K contraction per step.
    N_NODES = 300
    INPUT_DIM = 50
    HIDDEN_DIM = 64
    N_EDGES = 1000
    N_LABEL = 200

    key = jax.random.PRNGKey(0)
    k_x, k_ei, k_eli, k_w1, k_b1, k_w2, k_b2 = jax.random.split(key, 7)

    x = jax.random.normal(k_x, (N_NODES, INPUT_DIM), dtype=jnp.float32)
    edge_index = jax.random.randint(k_ei, (2, N_EDGES), 0, N_NODES, dtype=jnp.int32)
    edge_label_index = jax.random.randint(
        k_eli, (2, N_LABEL), 0, N_NODES, dtype=jnp.int32)

    def glorot(k, fan_in, fan_out):
        lim = jnp.sqrt(6.0 / (fan_in + fan_out))
        return jax.random.uniform(k, (fan_in, fan_out), jnp.float32, -lim, lim)

    w1 = glorot(k_w1, INPUT_DIM, HIDDEN_DIM)
    b1 = 0.1 * jax.random.normal(k_b1, (HIDDEN_DIM,), dtype=jnp.float32)
    w2 = glorot(k_w2, HIDDEN_DIM, HIDDEN_DIM)
    b2 = 0.1 * jax.random.normal(k_b2, (HIDDEN_DIM,), dtype=jnp.float32)

    adj_hat = build_normalized_adj(edge_index, N_NODES)

    pred = gcn_link_pred(adj_hat, x, w1, b1, w2, b2, edge_label_index,
                         compute_dtype=jnp.bfloat16)
    pred = jax.block_until_ready(pred)

    # Pure-JAX reference with the SAME bf16 cast points + f32 accumulation.
    cd = jnp.bfloat16

    def mm(a, b):
        return jnp.dot(a.astype(cd), b.astype(cd),
                       preferred_element_type=jnp.float32)

    xw1_ref = mm(x, w1).astype(cd)
    h1_ref = jnp.maximum(mm(adj_hat, xw1_ref) + b1, 0.0)
    hw2_ref = mm(h1_ref, w2).astype(cd)
    h2_ref = mm(adj_hat, hw2_ref) + b2
    ref = jnp.sum(h2_ref[edge_label_index[0]] * h2_ref[edge_label_index[1]],
                  axis=-1)

    assert pred.shape == (N_LABEL,)
    max_err = float(jnp.max(jnp.abs(pred - ref)))
    assert jnp.allclose(pred, ref, atol=2e-2, rtol=2e-2), max_err

    print("KERNEL_OK")
</pallas_src>

<mosaic_0001>
module attributes {stable_mosaic.version = 11 : i64} {
  func.func @_gcn_layer_kernel(%arg0: i32, %arg1: memref<256x128xbf16, #tpu.memory_space<vmem>>, %arg2: memref<128x128xbf16, #tpu.memory_space<vmem>>, %arg3: memref<1x128xf32, #tpu.memory_space<vmem>>, %arg4: memref<256x128xbf16, #tpu.memory_space<vmem>>) attributes {dimension_semantics = [#tpu.dimension_semantics<parallel>], iteration_bounds = array<i64: 2>, scalar_prefetch = 0 : i64, scratch_operands = 0 : i64, tpu.core_type = #tpu.core_type<tc>, window_params = [{transform_indices = @transform_0, window_bounds = array<i64: 256, 128>}, {pipeline_mode = #tpu.pipeline_mode<synchronous>, transform_indices = @transform_1, window_bounds = array<i64: 128, 128>}, {pipeline_mode = #tpu.pipeline_mode<synchronous>, transform_indices = @transform_2, window_bounds = array<i64: 1, 128>}, {transform_indices = @transform_3, window_bounds = array<i64: 256, 128>}]} {
    %c0 = arith.constant 0 : index
    %c0_0 = arith.constant 0 : index
    %0 = vector.load %arg1[%c0, %c0_0] : memref<256x128xbf16, #tpu.memory_space<vmem>>, vector<256x128xbf16>
    %c0_1 = arith.constant 0 : index
    %c0_2 = arith.constant 0 : index
    %1 = vector.load %arg2[%c0_1, %c0_2] : memref<128x128xbf16, #tpu.memory_space<vmem>>, vector<128x128xbf16>
    %cst = arith.constant dense<0.000000e+00> : vector<256x128xf32>
    %2 = tpu.matmul %0, %1, %cst {dimension_numbers = #tpu.dot_dimension_numbers<[1], [0], [0], [1], [0, 0, 1, 1], [], []>} : vector<256x128xbf16>, vector<128x128xbf16>, vector<256x128xf32> -> vector<256x128xf32>
    %c0_3 = arith.constant 0 : index
    %c0_4 = arith.constant 0 : index
    %3 = vector.load %arg3[%c0_3, %c0_4] : memref<1x128xf32, #tpu.memory_space<vmem>>, vector<1x128xf32>
    %4 = vector.broadcast %3 : vector<1x128xf32> to vector<256x128xf32>
    %5 = arith.addf %2, %4 : vector<256x128xf32>
    %6 = arith.truncf %5 : vector<256x128xf32> to vector<256x128xbf16>
    %c0_5 = arith.constant 0 : index
    %c0_6 = arith.constant 0 : index
    %7 = vector.load %arg4[%c0_5, %c0_6] : memref<256x128xbf16, #tpu.memory_space<vmem>>, vector<256x128xbf16>
    tpu.vector_store %arg4[%c0_5, %c0_6], %6 {strides = array<i32>} : memref<256x128xbf16, #tpu.memory_space<vmem>>, vector<256x128xbf16>,
    return
  }
  func.func @transform_0(%arg0: i32) -> (i32, i32) {
    %c0_i32 = arith.constant 0 : i32
    %c0_i32_0 = arith.constant 0 : i32
    return %arg0, %c0_i32 : i32, i32
  }
  func.func @transform_1(%arg0: i32) -> (i32, i32) {
    %c0_i32 = arith.constant 0 : i32
    %c0_i32_0 = arith.constant 0 : i32
    %c0_i32_1 = arith.constant 0 : i32
    return %c0_i32, %c0_i32_0 : i32, i32
  }
  func.func @transform_2(%arg0: i32) -> (i32, i32) {
    %c0_i32 = arith.constant 0 : i32
    %c0_i32_0 = arith.constant 0 : i32
    %c0_i32_1 = arith.constant 0 : i32
    return %c0_i32, %c0_i32_0 : i32, i32
  }
  func.func @transform_3(%arg0: i32) -> (i32, i32) {
    %c0_i32 = arith.constant 0 : i32
    %c0_i32_0 = arith.constant 0 : i32
    return %arg0, %c0_i32 : i32, i32
  }
}

</mosaic_0001>

<bundles_post_ra>
// kernel: tpu_custom_call.1
= control target key start
LH: loop header
LB: loop body
LE: loop exit
PB: predicated region body
PF: predicated region fallthrough
CT: control target
= control target key end

     0   :  { %8 = vsyncpa [#allocation3], 0  ;;  %s1641_s0 = inlined_call_operand.hbm [shape: bf16[512,128], index: 0, kind: input, shape index: {}]   ;;  %s1642_s1 = inlined_call_operand.hbm [shape: bf16[128,128], index: 1, kind: input, shape index: {}]   ;;  %s1643_s2 = inlined_call_operand.vmem [shape: f32[1,128], index: 2, kind: input, shape index: {}]   ;;  %s1644_s3 = inlined_call_operand.hbm [shape: bf16[512,128], index: 3, kind: output, shape index: {}]  }
   0x1   :  { %10 = vsyncpa [#allocation3 + $0x1], 0 }
   0x2   :  { %11 = vsyncpa [#allocation6], 0 }
   0x3   :  { %12 = vsyncpa [#allocation4], 0 }
   0x4   :  { %14 = vsyncpa [#allocation4 + $0x1], 0  ;;  %s1356_s12 = smov 0   ;;  %s1358_s13 = smov 0  }
   0x5   :  { %s1360_s14 = smov 0   ;;  %s1362_s15 = smov 0  }
   0x6 LB: > { %s1377_s16 = sadd.s32 4294967295, %s1327_s15   ;;  %s824_s17 = sadd.s32 4294967294, %s1327_s15   ;;  %s1327_s15 = sphi %s1362_s15, %s1664_s15   ;;  %s1323_s14 = sphi %s1360_s14, %s1663_s14   ;;  %s1319_s13 = sphi %s1358_s13, %s1662_s13   ;;  %s1315_s12 = sphi %s1356_s12, %s1661_s12  }
   0x7   : > { %p40_p0 = scmp.ne.s32.totalorder %s1319_s13, %s1315_s12  ;;  %p1645_p1 = scmp.eq.s32.totalorder %s1377_s16, 0 }
   0x8   : > { %p112_p3 = scmp.eq.s32.totalorder %s824_s17, 1  ;;  %p825_p5 = scmp.ge.s32.totalorder %s1327_s15, 1 }
   0x9   : > { %p1386_p4 = por %p1645_p1, %p40_p0  ;;  %p119_p7 = scmp.lt.s32.totalorder %s1327_s15, 3 }
   0xa   : > { %p1391_p6 = por %p112_p3, %p40_p0  ;;  %s1329_s21 = smov [#allocation5]  }
   0xb   : > { %s1648_s18 = scalar_select %p1386_p4, 1, 0 }
   0xc   : > { %s1649_s19 = scalar_select %p1391_p6, 1, 0 }
   0xd   : > { %p1396_p8 = pnand %p825_p5, %p119_p7  ;;  %s131_s22 = sshll.u32 %s1329_s21, 4  ;;  %s1400_s22 = int_to_ptr.vmem [resolvable:$true] %s131_s22 }
   0xe   : > { %s1412_s24 = sadd.s32 1, %s1327_s15   ;;  %s27_s25 = sadd.s32 1, %s1323_s14 }
   0xf   : > { %s1650_s20 = scalar_select %p1396_p8, 1, 0 }
  0x10   : > { %p1122_p9 = pneg %p1396_p8  ;;  %s24_s26 = ssub.s32 %s1327_s15, %s1412_s24 }
  0x11   : > { %s1199_s29 = scalar_lea.hbm %s1642_s1, 1024 }
  0x12   : > { %p1407_p11 = pnand %p1122_p9, %p1645_p1  ;;  %p1200_p12 = scmp.ne.s32.totalorder %s1642_s1, %s1199_s29 }
  0x13   : > { %p1206_p5 = scmp.lt.u32.totalorder %s1199_s29, %s1642_s1 }
  0x14   : > { %p1201_p13 = pneg %p1407_p11 }
  0x16   : > { %p1202_p0 = pnand %p1201_p13, %p1200_p12 }
  0x18   : > { %p1203_p3 = pneg %p1202_p0 }
  0x1a   : > { %p1208_p7 = pnand %p1206_p5, %p1203_p3 }
  0x1c   : > { %1211 = shalt.err (!%p1208_p7)
}
  0x1d   : > { %s1212_s7 = scalar_lea.vmem %s1400_s22, 1024  ;;  %p1220_p2 = scmp.lt.s32.totalorder %s1400_s22, %s1400_s22 }
  0x1e   : > { %p1213_p9 = scmp.ne.s32.totalorder %s1400_s22, %s1212_s7  ;;  %p1221_p6 = scmp.lt.s32.totalorder %s1212_s7, %s1212_s7 }
  0x20   : > { %p1215_p10 = pnand %p1213_p9, %p1201_p13  ;;  %p1222_p4 = por %p1221_p6, %p1220_p2 }
  0x22   : > { %p1216_p1 = pneg %p1215_p10 }
  0x24   : > { %p1223_p8 = pnand %p1222_p4, %p1216_p1 }
  0x26   : > { %1226 = shalt.err (!%p1223_p8)
}
  0x27   : > { %s1330_s8 = smov 64   ;;  %s1331_s9 = smov 4  }
  0x28   : > { %1125 = dma.hbm_to_vmem [thread:$0]  (!%p1407_p11), %s1642_s1, 1024, %s1400_s22, [#allocation6], %s1330_s8, %s1330_s8, %s1331_s9  }
  0x29   : > { %p25_p1 = scmp.eq.s32.totalorder %s24_s26, 0  ;;  %p34_p2 = scmp.ne.s32.totalorder %s1323_s14, %s1319_s13 }
  0x2a   : > { %p35_p4 = scmp.eq.s32.totalorder %s1327_s15, 0  ;;  %p1135_p6 = scmp.lt.s32.totalorder %s1327_s15, 2 }
  0x2b   : > { %s1446_s17 = scalar_select %p25_p1, %s1323_s14, %s27_s25  }
  0x2c   : > { %p36_p8 = por %p35_p4, %p34_p2  ;;  %p1652_p10 = scmp.eq.s32.totalorder %s1377_s16, 1 }
  0x2d   : > { %s148_s23 = sand.u32 1, %s1323_s14   ;;  %s897_s27 = sshll.u32 %s1327_s15, 11 }
  0x2e   : > { %p1450_p12 = por %p1652_p10, %p34_p2  ;;  %s828_s28 = sshll.u32 %s148_s23, 7 }
  0x2f   : > { %s1459_s4 = scalar_lea.hbm %s1641_s0, %s897_s27  ;;  %s152_s22 = scalar_lea.vmem [#allocation2], %s828_s28 }
  0x30   : > { %s159_s25 = sshll.u32 %s152_s22, 4  ;;  %p1461_p11 = pnand %p1135_p6, %p36_p8  ;;  %s1465_s25 = int_to_ptr.vmem [resolvable:$true] %s159_s25 }
  0x31   : > { %s1467_s5 = scalar_lea.sflag [#allocation3], %s148_s23  ;;  %s1227_s6 = scalar_lea.hbm %s1459_s4, 2048 }
  0x32   : > { %p1228_p13 = scmp.ne.s32.totalorder %s1459_s4, %s1227_s6  ;;  %p1229_p0 = pneg %p1461_p11 }
  0x33   : > { %s1232_s11 = scalar_lea.hbm %s1641_s0, 4096  ;;  %p1233_p7 = scmp.lt.u32.totalorder %s1459_s4, %s1641_s0 }
  0x34   : > { %p1230_p3 = pnand %p1229_p0, %p1228_p13  ;;  %p1234_p9 = scmp.lt.u32.totalorder %s1232_s11, %s1227_s6 }
  0x35   : > { %p1236_p2 = scmp.lt.u32.totalorder %s1227_s6, %s1459_s4 }
  0x36   : > { %p1231_p5 = pneg %p1230_p3  ;;  %p1235_p1 = por %p1234_p9, %p1233_p7 }
  0x38   : > { %p1237_p4 = por %p1236_p2, %p1235_p1 }
  0x3a   : > { %p1238_p6 = pnand %p1237_p4, %p1231_p5 }
  0x3c   : > { %1241 = shalt.err (!%p1238_p6)
}
  0x3d   : > { %s1242_s23 = scalar_lea.vmem %s1465_s25, 2048  ;;  %s1332_s29 = smov [#allocation2]  }
  0x3e   : > { %p1243_p8 = scmp.ne.s32.totalorder %s1465_s25, %s1242_s23  ;;  %s1247_s30 = sshll.u32 %s1332_s29, 4  ;;  %s1248_s30 = int_to_ptr.vmem [resolvable:$false] %s1247_s30 }
  0x3f   : > { %s1249_s22 = scalar_lea.vmem %s1248_s30, 4096  ;;  %p1250_p3 = scmp.lt.s32.totalorder %s1465_s25, %s1248_s30 }
  0x40   : > { %p1245_p10 = pnand %p1243_p8, %p1229_p0  ;;  %p1251_p7 = scmp.lt.s32.totalorder %s1249_s22, %s1242_s23 }
  0x42   : > { %p1246_p13 = pneg %p1245_p10  ;;  %p1252_p9 = por %p1251_p7, %p1250_p3 }
  0x44   : > { %p1253_p1 = pnand %p1252_p9, %p1246_p13 }
  0x46   : > { %1256 = shalt.err (!%p1253_p1)
}
  0x47   : > { %1129 = dma.hbm_to_vmem [thread:$0]  (!%p1461_p11), %s1459_s4, 2048, %s1465_s25, %s1467_s5, %s1330_s8, %s1330_s8, %s1331_s9  }
  0x48   : > { %p1655_p0 = scmp.ne.s32.totalorder %s1650_s20, 0 }
  0x49   : > { %s1501_s6 = sand.u32 (!%p1655_p0), 1, %s1319_s13   ;;  %p1656_p5 = scmp.ne.s32.totalorder (!%p1655_p0), %s1648_s18, 0 }
  0x4a   : > { %171 = sbr.rel (%p1655_p0) target bundleno = 376 (0x178), region = 32  ;;  %s832_s7 = sshll.u32 (!%p1655_p0), %s1501_s6, 7 }
  0x4b   : > { %s174_s10 = scalar_lea.sflag (!%p1655_p0), [#allocation3], %s1501_s6  ;;  %s1507_s26 = scalar_lea.vmem (!%p1655_p0), [#allocation2], %s832_s7 }
  0x51   : > { %1302 = dma.done.wait (%p1656_p5), %s174_s10, 2048  }
  0x52   : > { %1304 = vsyncadd (%p1656_p5), %s174_s10, 4294965248  ;;  %p1657_p11 = scmp.eq.s32.totalorder %s1377_s16, 0 }
  0x54   : > { %1306 = dma.done.wait (%p1657_p11), [#allocation6], 1024   ;;  %p1658_p2 = pmov %p1657_p11 }
  0x55   : > { %v1175_v0 = vld [vmem:[#allocation5] sm:$0xff]   ;;  %v1176_v1 = vld [vmem:[#allocation5 + $0x8] sm:$0xff]   ;;  %v1177_v2 = vld [vmem:[#allocation5 + $0x10] sm:$0xff]   ;;  %s1548_s8 = scalar_lea.vmem [#allocation7], %s832_s7  ;;  %s930_s9 = sshll.u32 %s1377_s16, 11 }
  0x56   : > { %1308 = vsyncadd (%p1658_p2), [#allocation6], 4294966272  ;;  %1050 = vmatprep.subr.bf16.mxu0 %v1175_v0  ;;  %1098 = vmatprep.subr.bf16.mxu1 %v1175_v0  ;;  %v1178_v3 = vld [vmem:[#allocation5 + $0x18] sm:$0xff]   ;;  %v1183_v4 = vld [vmem:[%s1507_s26] sm:$0xff]   ;;  %s741_s4 = sshll.u32 %s1548_s8, 4  ;;  %s1591_s5 = scalar_lea.hbm %s1644_s3, %s930_s9  ;;  %s1593_s4 = int_to_ptr.vmem [resolvable:$true] %s741_s4 }
  0x57   : > { %1051 = vmatpush3.bf16.msra.mxu0 %v1175_v0  ;;  %1106 = vmatpush3.bf16.msra.mxu1 %v1175_v0  ;;  %v1184_v5 = vld [vmem:[%s1507_s26 + $0x40] sm:$0xff]   ;;  %v1180_v7 = vld [vmem:[#allocation5 + $0x28] sm:$0xff]   ;;  %v1181_v8 = vld [vmem:[#allocation5 + $0x30] sm:$0xff]   ;;  %s728_s11 = scalar_lea.sflag [#allocation4], %s1501_s6  ;;  %s1257_s27 = scalar_lea.vmem %s1593_s4, 2048 }
  0x58   : > { %1052 = vmatprep.subr.bf16.mxu0 %v1176_v1  ;;  %1099 = vmatprep.subr.bf16.mxu1 %v1176_v1  ;;  %v1179_v6 = vld [vmem:[#allocation5 + $0x20] sm:$0xff]   ;;  %v1182_v9 = vld [vmem:[#allocation5 + $0x38] sm:$0xff]   ;;  %v1185_v10 = vld [vmem:[%s1507_s26 + $0x8] sm:$0xff]   ;;  %p1258_p4 = scmp.ne.s32.totalorder %s1593_s4, %s1257_s27  ;;  %s1333_s28 = smov [#allocation7]  }
  0x59   : > { %1066 = vmatprep.mubr.bf16.mxu0 %v1183_v4  ;;  %1082 = vmatprep.mubr.bf16.mxu1 %v1184_v5  ;;  %v1186_v11 = vld [vmem:[%s1507_s26 + $0x48] sm:$0xff]   ;;  %v1187_v12 = vld [vmem:[%s1507_s26 + $0x10] sm:$0xff]   ;;  %v1189_v14 = vld [vmem:[%s1507_s26 + $0x18] sm:$0xff]   ;;  %s1261_s23 = sshll.u32 %s1333_s28, 4  ;;  %s1262_s23 = int_to_ptr.vmem [resolvable:$false] %s1261_s23 }
  0x5a   : > { %v1188_v13 = vld [vmem:[%s1507_s26 + $0x50] sm:$0xff]   ;;  %v1190_v15 = vld [vmem:[%s1507_s26 + $0x58] sm:$0xff]   ;;  %v1191_v16 = vld [vmem:[%s1507_s26 + $0x20] sm:$0xff]   ;;  %p1259_p6 = pnand %p1258_p4, %p1450_p12  ;;  %s1263_s29 = scalar_lea.vmem %s1262_s23, 4096 }
  0x5b   : > { %1053 = vmatpush3.bf16.msra.mxu0 %v1176_v1  ;;  %1107 = vmatpush3.bf16.msra.mxu1 %v1176_v1  ;;  %v1192_v17 = vld [vmem:[%s1507_s26 + $0x60] sm:$0xff]   ;;  %v1193_v18 = vld [vmem:[%s1507_s26 + $0x28] sm:$0xff]   ;;  %v1195_v20 = vld [vmem:[%s1507_s26 + $0x30] sm:$0xff]   ;;  %p1264_p10 = scmp.lt.s32.totalorder %s1593_s4, %s1262_s23  ;;  %p1265_p13 = scmp.lt.s32.totalorder %s1263_s29, %s1257_s27 }
  0x5c   : > { %1054 = vmatprep.subr.bf16.mxu0 %v1177_v2  ;;  %1100 = vmatprep.subr.bf16.mxu1 %v1177_v2  ;;  %v1194_v19 = vld [vmem:[%s1507_s26 + $0x68] sm:$0xff]   ;;  %v1196_v21 = vld [vmem:[%s1507_s26 + $0x70] sm:$0xff]   ;;  %v1197_v22 = vld [vmem:[%s1507_s26 + $0x38] sm:$0xff]   ;;  %p1260_p8 = pneg %p1259_p6 }
  0x5d   : > { %v1198_v23 = vld [vmem:[%s1507_s26 + $0x78] sm:$0xff]   ;;  %v1536_v25 = vld [vmem:[%s1643_s2] ss:$0 sm:$0xff]  ;;  %p1266_p3 = por %p1265_p13, %p1264_p10 }
  0x5f   : > { %1055 = vmatpush3.bf16.msra.mxu0 %v1177_v2  ;;  %1108 = vmatpush3.bf16.msra.mxu1 %v1177_v2  ;;  %p1267_p7 = pnand %p1266_p3, %p1260_p8 }
  0x60   : > { %1056 = vmatprep.subr.bf16.mxu0 %v1178_v3  ;;  %1101 = vmatprep.subr.bf16.mxu1 %v1178_v3 }
  0x63   : > { %1057 = vmatpush3.bf16.msra.mxu0 %v1178_v3  ;;  %1109 = vmatpush3.bf16.msra.mxu1 %v1178_v3 }
  0x64   : > { %1058 = vmatprep.subr.bf16.mxu0 %v1179_v6  ;;  %1102 = vmatprep.subr.bf16.mxu1 %v1179_v6 }
  0x67   : > { %1059 = vmatpush3.bf16.msra.mxu0 %v1179_v6  ;;  %1110 = vmatpush3.bf16.msra.mxu1 %v1179_v6 }
  0x68   : > { %1060 = vmatprep.subr.bf16.mxu0 %v1180_v7  ;;  %1103 = vmatprep.subr.bf16.mxu1 %v1180_v7 }
  0x6b   : > { %1061 = vmatpush3.bf16.msra.mxu0 %v1180_v7  ;;  %1111 = vmatpush3.bf16.msra.mxu1 %v1180_v7 }
  0x6c   : > { %1062 = vmatprep.subr.bf16.mxu0 %v1181_v8  ;;  %1104 = vmatprep.subr.bf16.mxu1 %v1181_v8 }
  0x6f   : > { %1063 = vmatpush3.bf16.msra.mxu0 %v1181_v8  ;;  %1112 = vmatpush3.bf16.msra.mxu1 %v1181_v8 }
  0x70   : > { %1064 = vmatprep.subr.bf16.mxu0 %v1182_v9  ;;  %1105 = vmatprep.subr.bf16.mxu1 %v1182_v9 }
  0x73   : > { %1065 = vmatpush3.bf16.msra.mxu0 %v1182_v9  ;;  %1113 = vmatpush3.bf16.msra.mxu1 %v1182_v9 }
  0x76   : > { %1067 = vmatmul.mubr.bf16.vlgmr.msra.gmra.mrb[0].mxu0 %v1185_v10  ;;  %1083 = vmatmul.mubr.bf16.vlgmr.msra.gmra.mrb[0].mxu1 %v1186_v11 }
  0x77   : > { %1070 = vmatprep.mubr.bf16.mxu0 %v1187_v12  ;;  %1086 = vmatprep.mubr.bf16.mxu1 %v1188_v13 }
  0x7e   : > { %1071 = vmatmul.mubr.bf16.gmra.mrb[4].mxu0 %v1189_v14  ;;  %1087 = vmatmul.mubr.bf16.gmra.mrb[4].mxu1 %v1190_v15 }
  0x7f   : > { %1074 = vmatprep.mubr.bf16.mxu0 %v1191_v16  ;;  %1090 = vmatprep.mubr.bf16.mxu1 %v1192_v17 }
  0x86   : > { %1075 = vmatmul.mubr.bf16.gmra.mrb[8].mxu0 %v1193_v18  ;;  %1091 = vmatmul.mubr.bf16.gmra.mrb[8].mxu1 %v1194_v19 }
  0x87   : > { %1078 = vmatprep.mubr.bf16.mxu0 %v1195_v20  ;;  %1094 = vmatprep.mubr.bf16.mxu1 %v1196_v21 }
  0x8e   : > { %1079 = vmatmul.mubr.bf16.gmra.mrb[12].mxu0 %v1197_v22  ;;  %1095 = vmatmul.mubr.bf16.gmra.mrb[12].mxu1 %v1198_v23 }
 0x149   : > { %v1068_v24 = vpop.f32.mrb[0].mxu0  ;;  %v1084_v26 = vpop.f32.mrb[0].mxu1 }
 0x14a   : > { %v440_v27 = vpop.f32.mrb[1].mxu0  ;;  %v504_v28 = vpop.f32.mrb[1].mxu1  ;;  %v449_v31 = vadd.f32 %v1068_v24, %v1536_v25  ;;  %v513_v32 = vadd.f32 %v1084_v26, %v1536_v25 }
 0x14b   : > { %v1069_v29 = vpop.f32.mrb[2].mxu0  ;;  %v1085_v30 = vpop.f32.mrb[2].mxu1  ;;  %v441_v37 = vadd.f32 %v1536_v25, %v440_v27  ;;  %v505_v38 = vadd.f32 %v1536_v25, %v504_v28 }
 0x14c   : > { %v452_v33 = vadd.f32 %v1069_v29, %v1536_v25  ;;  %v516_v34 = vadd.f32 %v1085_v30, %v1536_v25  ;;  %v443_v35 = vpop.f32.mrb[3].mxu0  ;;  %v507_v36 = vpop.f32.mrb[3].mxu1 }
 0x14d   : > { %v444_v39 = vadd.f32 %v1536_v25, %v443_v35  ;;  %v508_v40 = vadd.f32 %v1536_v25, %v507_v36 }
 0x14e   : > { %v939_v41 = vpack.c.bf16 %v452_v33, %v449_v31  ;;  %v979_v42 = vpack.c.bf16 %v516_v34, %v513_v32 }
 0x14f   : > { %v934_v43 = vpack.c.bf16 %v444_v39, %v441_v37  ;;  %v974_v44 = vpack.c.bf16 %v508_v40, %v505_v38 }
 0x150   : > { %1011 = vst [vmem:[%s1548_s8 + $0x8] sm:$0xff] %v939_v41   ;;  %1019 = vst [vmem:[%s1548_s8 + $0x48] sm:$0xff] %v979_v42  }
 0x151   : > { %935 = vst [vmem:[%s1548_s8] sm:$0xff] %v934_v43   ;;  %1018 = vst [vmem:[%s1548_s8 + $0x40] sm:$0xff] %v974_v44   ;;  %v1072_v45 = vpop.f32.mrb[4].mxu0  ;;  %v1088_v46 = vpop.f32.mrb[4].mxu1 }
 0x152   : > { %v456_v47 = vpop.f32.mrb[5].mxu0  ;;  %v520_v48 = vpop.f32.mrb[5].mxu1  ;;  %v465_v51 = vadd.f32 %v1072_v45, %v1536_v25  ;;  %v529_v52 = vadd.f32 %v1088_v46, %v1536_v25 }
 0x153   : > { %v1073_v49 = vpop.f32.mrb[6].mxu0  ;;  %v1089_v50 = vpop.f32.mrb[6].mxu1  ;;  %v457_v57 = vadd.f32 %v1536_v25, %v456_v47  ;;  %v521_v58 = vadd.f32 %v1536_v25, %v520_v48 }
 0x154   : > { %v468_v53 = vadd.f32 %v1073_v49, %v1536_v25  ;;  %v532_v54 = vadd.f32 %v1089_v50, %v1536_v25  ;;  %v459_v55 = vpop.f32.mrb[7].mxu0  ;;  %v523_v56 = vpop.f32.mrb[7].mxu1 }
 0x155   : > { %v460_v59 = vadd.f32 %v1536_v25, %v459_v55  ;;  %v524_v60 = vadd.f32 %v1536_v25, %v523_v56 }
 0x156   : > { %v949_v61 = vpack.c.bf16 %v468_v53, %v465_v51  ;;  %v989_v62 = vpack.c.bf16 %v532_v54, %v529_v52 }
 0x157   : > { %v944_v63 = vpack.c.bf16 %v460_v59, %v457_v57  ;;  %v984_v0 = vpack.c.bf16 %v524_v60, %v521_v58 }
 0x158   : > { %1013 = vst [vmem:[%s1548_s8 + $0x18] sm:$0xff] %v949_v61   ;;  %1021 = vst [vmem:[%s1548_s8 + $0x58] sm:$0xff] %v989_v62  }
 0x159   : > { %1012 = vst [vmem:[%s1548_s8 + $0x10] sm:$0xff] %v944_v63   ;;  %1020 = vst [vmem:[%s1548_s8 + $0x50] sm:$0xff] %v984_v0   ;;  %v1076_v1 = vpop.f32.mrb[8].mxu0  ;;  %v1092_v2 = vpop.f32.mrb[8].mxu1 }
 0x15a   : > { %v472_v3 = vpop.f32.mrb[9].mxu0  ;;  %v536_v4 = vpop.f32.mrb[9].mxu1  ;;  %v481_v7 = vadd.f32 %v1076_v1, %v1536_v25  ;;  %v545_v8 = vadd.f32 %v1092_v2, %v1536_v25 }
 0x15b   : > { %v1077_v5 = vpop.f32.mrb[10].mxu0  ;;  %v1093_v6 = vpop.f32.mrb[10].mxu1  ;;  %v473_v13 = vadd.f32 %v1536_v25, %v472_v3  ;;  %v537_v14 = vadd.f32 %v1536_v25, %v536_v4 }
 0x15c   : > { %v484_v9 = vadd.f32 %v1077_v5, %v1536_v25  ;;  %v548_v10 = vadd.f32 %v1093_v6, %v1536_v25  ;;  %v475_v11 = vpop.f32.mrb[11].mxu0  ;;  %v539_v12 = vpop.f32.mrb[11].mxu1 }
 0x15d   : > { %v476_v15 = vadd.f32 %v1536_v25, %v475_v11  ;;  %v540_v16 = vadd.f32 %v1536_v25, %v539_v12 }
 0x15e   : > { %v959_v17 = vpack.c.bf16 %v484_v9, %v481_v7  ;;  %v999_v18 = vpack.c.bf16 %v548_v10, %v545_v8 }
 0x15f   : > { %v954_v19 = vpack.c.bf16 %v476_v15, %v473_v13  ;;  %v994_v20 = vpack.c.bf16 %v540_v16, %v537_v14 }
 0x160   : > { %1015 = vst [vmem:[%s1548_s8 + $0x28] sm:$0xff] %v959_v17   ;;  %1023 = vst [vmem:[%s1548_s8 + $0x68] sm:$0xff] %v999_v18  }
 0x161   : > { %1014 = vst [vmem:[%s1548_s8 + $0x20] sm:$0xff] %v954_v19   ;;  %1022 = vst [vmem:[%s1548_s8 + $0x60] sm:$0xff] %v994_v20   ;;  %v1080_v21 = vpop.f32.mrb[12].mxu0  ;;  %v1096_v22 = vpop.f32.mrb[12].mxu1 }
 0x162   : > { %v488_v23 = vpop.f32.mrb[13].mxu0  ;;  %v552_v24 = vpop.f32.mrb[13].mxu1  ;;  %v497_v28 = vadd.f32 %v1080_v21, %v1536_v25  ;;  %v561_v29 = vadd.f32 %v1096_v22, %v1536_v25 }
 0x163   : > { %v1081_v26 = vpop.f32.mrb[14].mxu0  ;;  %v1097_v27 = vpop.f32.mrb[14].mxu1  ;;  %v489_v34 = vadd.f32 %v1536_v25, %v488_v23  ;;  %v553_v35 = vadd.f32 %v1536_v25, %v552_v24 }
 0x164   : > { %v500_v30 = vadd.f32 %v1081_v26, %v1536_v25  ;;  %v564_v31 = vadd.f32 %v1097_v27, %v1536_v25  ;;  %v491_v32 = vpop.f32.mrb[15].mxu0  ;;  %v555_v33 = vpop.f32.mrb[15].mxu1 }
 0x165   : > { %v492_v36 = vadd.f32 %v1536_v25, %v491_v32  ;;  %v556_v37 = vadd.f32 %v1536_v25, %v555_v33 }
 0x166   : > { %v969_v38 = vpack.c.bf16 %v500_v30, %v497_v28  ;;  %v1009_v39 = vpack.c.bf16 %v564_v31, %v561_v29 }
 0x167   : > { %v964_v40 = vpack.c.bf16 %v492_v36, %v489_v34  ;;  %v1004_v41 = vpack.c.bf16 %v556_v37, %v553_v35 }
 0x168   : > { %1017 = vst [vmem:[%s1548_s8 + $0x38] sm:$0xff] %v969_v38   ;;  %1025 = vst [vmem:[%s1548_s8 + $0x78] sm:$0xff] %v1009_v39  }
 0x169   : > { %1016 = vst [vmem:[%s1548_s8 + $0x30] sm:$0xff] %v964_v40   ;;  %1024 = vst [vmem:[%s1548_s8 + $0x70] sm:$0xff] %v1004_v41  }
 0x16a   : > { %1270 = shalt.err (!%p1267_p7)
}
 0x16b   : > { %s1271_s30 = scalar_lea.hbm %s1591_s5, 2048  ;;  %s1275_s10 = scalar_lea.hbm %s1644_s3, 4096 }
 0x16c   : > { %p1272_p9 = scmp.ne.s32.totalorder %s1591_s5, %s1271_s30  ;;  %p1276_p5 = scmp.lt.u32.totalorder %s1591_s5, %s1644_s3 }
 0x16d   : > { %p1277_p11 = scmp.lt.u32.totalorder %s1275_s10, %s1271_s30  ;;  %p1279_p4 = scmp.lt.u32.totalorder %s1271_s30, %s1591_s5 }
 0x16e   : > { %p1273_p1 = pnand %p1272_p9, %p1450_p12 }
 0x16f   : > { %p1278_p2 = por %p1277_p11, %p1276_p5 }
 0x170   : > { %p1274_p0 = pneg %p1273_p1 }
 0x171   : > { %p1280_p6 = por %p1279_p4, %p1278_p2 }
 0x173   : > { %p1281_p8 = pnand %p1280_p6, %p1274_p0 }
 0x175   : > { %1284 = shalt.err (!%p1281_p8)
}
 0x176   : > { %s1334_s20 = smov 64   ;;  %s1335_s8 = smov 4  }
 0x177   : > { %1120 = dma.vmem_to_hbm [thread:$0]  (%p1450_p12), %s1593_s4, 2048, %s1591_s5, %s728_s11, %s1334_s20, %s1334_s20, %s1335_s8  }
 0x178 PF: > { %s756_s9 = sand.u32 1, %s1315_s12   ;;  %p1659_p10 = scmp.ne.s32.totalorder %s1649_s19, 0 }
 0x179   : > { %p1660_p13 = scmp.ge.s32.totalorder %s1327_s15, 2  ;;  %s757_s16 = scalar_lea.sflag [#allocation4], %s756_s9 }
 0x17b   : > { %p1131_p3 = pnand %p1660_p13, %p1659_p10 }
 0x17d   : > { %1310 = dma.done.wait (!%p1131_p3), %s757_s16, 2048  }
 0x17e   : > { %1312 = vsyncadd (!%p1131_p3), %s757_s16, 4294965248  ;;  %p17_p7 = scmp.ge.s32.totalorder %s1412_s24, 4   ;;  %s1661_s12 = smov %s1319_s13 }
 0x17f   : > { %s1662_s13 = smov %s1323_s14  ;;  %s1663_s14 = smov %s1446_s17 }
 0x180   : > { %s1664_s15 = smov %s1412_s24  ;;  %19 = sbr.rel (!%p17_p7) target bundleno = 6 (0x6), region = 81 }
 0x187   :  { %762 = vsyncpa [#allocation3], 1 }
 0x188   :  { %764 = vsyncpa [#allocation3 + $0x1], 1 }
 0x189   :  { %765 = vsyncpa [#allocation6], 1 }
 0x18a   :  { %766 = vsyncpa [#allocation4], 1 }
 0x18b   :  { %768 = vsyncpa [#allocation4 + $0x1], 1 }

</bundles_post_ra>
